<compile_context>
chip_gen: v7x
topology: tpu7x:2x2x1
jax: 0.10.0
libtpu: 0.0.40
codegen_flags: <defaults>
</compile_context>

<pallas_src>
import functools

import jax
import jax.numpy as jnp
import numpy as np
from jax.experimental import pallas as pl
from jax.experimental.pallas import tpu as pltpu


# ----------------------------------------------------------------------------
# Pallas kernel: fused separable bilinear warp for one (batch, row-tile) step
# ----------------------------------------------------------------------------
def _warp_kernel(im_ref, xy_ref, o_ref, *, H, W, C):
    """im_ref: (1, C*W, H) image laid out [c*W + w, h] (lane-dense over H)
       xy_ref: (1, 2, P)   sampling coords [x; y] for this output row tile
       o_ref : (1, C, P)   warped output, channels-major (lane-dense pixels)"""
    xy = xy_ref[0]                           # (2, P) float32
    x = xy[0:1, :] + 1.0                     # +1: shift into the zero-padded frame
    y = xy[1:2, :] + 1.0

    max_x = float(W + 1)                     # padded width  - 1
    max_y = float(H + 1)                     # padded height - 1
    x0f = jnp.clip(jnp.floor(x), 0.0, max_x)
    x1f = jnp.clip(jnp.floor(x) + 1.0, 0.0, max_x)
    y0f = jnp.clip(jnp.floor(y), 0.0, max_y)
    y1f = jnp.clip(jnp.floor(y) + 1.0, 0.0, max_y)

    # corner weights use the *clamped* upper indices, exactly like PyTorch
    dxw = x1f - x                            # (1, P)
    dyw = y1f - y

    # 0-based unpadded source row/col per corner; pad-ring corners become -1 or
    # H (resp. W) and never match a real source index, so their contribution is
    # exactly 0 (the zero padding) with no explicit masking.
    y0i = y0f.astype(jnp.int32) - 1          # (1, P) in [-1, H]
    y1i = y1f.astype(jnp.int32) - 1
    x0i = x0f.astype(jnp.int32) - 1          # (1, P) in [-1, W]
    x1i = x1f.astype(jnp.int32) - 1

    # Separable selection matrices (factorized one-hots):
    #   out[c,p] = sum_{h,w} im[c,h,w] * ROW[h,p] * COL[w,p]
    h_iota = jax.lax.broadcasted_iota(jnp.int32, (H, 1), 0)
    w_iota = jax.lax.broadcasted_iota(jnp.int32, (W, 1), 0)
    row_sel = (dyw * (h_iota == y0i).astype(jnp.float32)
               + (1.0 - dyw) * (h_iota == y1i).astype(jnp.float32))   # (H, P)
    col_sel = (dxw * (w_iota == x0i).astype(jnp.float32)
               + (1.0 - dxw) * (w_iota == x1i).astype(jnp.float32))   # (W, P)

    # Stage 1 (MXU): gather + blend the two source rows for every (c, w):
    #   (C*W, H) @ (H, P) -> (C*W, P), exact-ish f32 accumulation.
    t = jax.lax.dot_general(im_ref[0], row_sel, (((1,), (0,)), ((), ())),
                            precision=jax.lax.Precision.HIGHEST,
                            preferred_element_type=jnp.float32)

    # Stage 2 (VPU/XLU): blend the two source columns, per channel
    # (only a W-sized sublane reduce per channel -> tiny).
    rows = [jnp.sum(t[c * W:(c + 1) * W, :] * col_sel, axis=0, keepdims=True)
            for c in range(C)]
    out = rows[0] if C == 1 else jnp.concatenate(rows, axis=0)         # (C, P)
    o_ref[0] = out.astype(o_ref.dtype)


# ----------------------------------------------------------------------------
# Hardware-aware row-tile / VMEM-limit selection
# ----------------------------------------------------------------------------
def _round_up(x, m):
    return -(-x // m) * m


def _pick_row_tile(B, H, W, C):
    try:
        cap = int(pltpu.get_tpu_info().vmem_capacity_bytes)
    except Exception:  # pragma: no cover - conservative fallback (v7x size)
        cap = 64 << 20

    # Only TR*W % 128 == 0 (or TR == H) is required: second-to-last block dims
    # (C*W, 2, C) are all full-extent.
    feasible = sorted({tr for tr in range(1, H + 1)
                       if H % tr == 0 and ((tr * W) % 128 == 0 or tr == H)})

    def need_bytes(tr):
        p = _round_up(tr * W, 128)
        im_blk = _round_up(C * W, 8) * _round_up(H, 128) * 4 * 2   # double-buffered
        xy_blk = 8 * p * 4 * 2
        out_blk = _round_up(C, 8) * p * 4 * 2
        # live temporaries: ROW (H,P), COL (W,P), stage-1 result (C*W,P),
        # stage-2 products and compare temps, with headroom.
        temps = (3 * H + 4 * W + 3 * C * W) * p * 4
        return im_blk + xy_blk + out_blk + temps

    budget = int(cap * 0.7)
    ok = [tr for tr in feasible if need_bytes(tr) <= budget]
    if not ok:
        ok = [feasible[0]]          # smallest legal tile; may spill for huge images
    tr = ok[-1]

    # v7x has 2 TensorCores: keep >= 2 parallel grid steps when possible.
    if B * (H // tr) < 2:
        smaller = [t for t in ok if H // t >= 2]
        if smaller:
            tr = smaller[-1]

    vmem_limit = int(min(cap - (8 << 20),
                         max(need_bytes(tr) + (8 << 20), 32 << 20)))
    vmem_limit = max(vmem_limit, 16 << 20)
    return tr, vmem_limit


# ----------------------------------------------------------------------------
# Wrapper: SpatialTransformation.forward
# ----------------------------------------------------------------------------
@jax.jit
def spatial_transformation(moving_image, deformation_matrix):
    """moving_image: (B, H, W, C); deformation_matrix: (B, H, W, 2) [dx, dy].
    Returns the warped image, (B, H, W, C) float32."""
    B, H, W, C = moving_image.shape
    assert deformation_matrix.shape == (B, H, W, 2)
    Q = H * W

    # meshgrid + "x_new = dx + x_mesh": trivial index math kept as XLA glue.
    j_mesh = jnp.arange(W, dtype=jnp.float32)[None, None, :]
    i_mesh = jnp.arange(H, dtype=jnp.float32)[None, :, None]
    x_new = deformation_matrix[..., 0].astype(jnp.float32) + j_mesh
    y_new = deformation_matrix[..., 1].astype(jnp.float32) + i_mesh
    coords = jnp.stack([x_new.reshape(B, Q), y_new.reshape(B, Q)], axis=1)  # (B,2,Q)

    # lane-dense image layout for the kernel: im2[b, c*W + w, h] = moving[b,h,w,c]
    im_cwh = jnp.transpose(moving_image.astype(jnp.float32),
                           (0, 3, 2, 1)).reshape(B, C * W, H)

    TR, vmem_limit = _pick_row_tile(B, H, W, C)
    grid = (B, H // TR)

    out_cm = pl.pallas_call(
        functools.partial(_warp_kernel, H=H, W=W, C=C),
        out_shape=jax.ShapeDtypeStruct((B, C, Q), jnp.float32),
        grid=grid,
        in_specs=[
            pl.BlockSpec((1, C * W, H), lambda b, r: (b, 0, 0)),   # full image
            pl.BlockSpec((1, 2, TR * W), lambda b, r: (b, 0, r)),  # coords tile
        ],
        out_specs=pl.BlockSpec((1, C, TR * W), lambda b, r: (b, 0, r)),
        compiler_params=pltpu.CompilerParams(
            dimension_semantics=("parallel", "parallel"),
            vmem_limit_bytes=vmem_limit),
    )(im_cwh, coords)

    # channels-major (B, C, H*W) -> module layout (B, H, W, C).
    # (A consumer that accepts NCHW could skip this transpose entirely.)
    return jnp.transpose(out_cm.reshape(B, C, H, W), (0, 2, 3, 1))


# ----------------------------------------------------------------------------
# Pure NumPy reference (direct transcription of the PyTorch module)
# ----------------------------------------------------------------------------
def _reference_numpy(moving, deform):
    moving = np.asarray(moving, np.float32)
    deform = np.asarray(deform, np.float32)
    B, H, W, C = moving.shape
    im = np.pad(moving, ((0, 0), (1, 1), (1, 1), (0, 0)))
    dx = deform[..., 0]
    dy = deform[..., 1]
    xm, ym = np.meshgrid(np.arange(W, dtype=np.float32),
                         np.arange(H, dtype=np.float32))
    x = dx + xm[None] + 1.0
    y = dy + ym[None] + 1.0
    max_x, max_y = W + 1, H + 1
    x0 = np.clip(np.floor(x), 0, max_x).astype(np.int64)
    x1 = np.clip(np.floor(x) + 1, 0, max_x).astype(np.int64)
    y0 = np.clip(np.floor(y), 0, max_y).astype(np.int64)
    y1 = np.clip(np.floor(y) + 1, 0, max_y).astype(np.int64)
    dxw = x1.astype(np.float32) - x
    dyw = y1.astype(np.float32) - y
    wa = dxw * dyw
    wb = dxw * (1.0 - dyw)
    wc = (1.0 - dxw) * dyw
    wd = (1.0 - dxw) * (1.0 - dyw)
    b = np.arange(B)[:, None, None]
    Ia = im[b, y0, x0]
    Ib = im[b, y1, x0]
    Ic = im[b, y0, x1]
    Id = im[b, y1, x1]
    out = (wa[..., None] * Ia + wb[..., None] * Ib
           + wc[..., None] * Ic + wd[..., None] * Id)
    return out.astype(np.float32)


# ----------------------------------------------------------------------------
if __name__ == "__main__":
    key = jax.random.PRNGKey(0)
    k_im, k_df = jax.random.split(key)

    B, H, W, C = 2, 16, 16, 4
    moving = jax.random.normal(k_im, (B, H, W, C), jnp.float32)
    # Moderate displacement field; some samples land in the zero-padded border,
    # exercising the clamp / padding path of the original module.
    deform = 3.0 * jax.random.normal(k_df, (B, H, W, 2), jnp.float32)

    out = spatial_transformation(moving, deform)
    out = jax.block_until_ready(out)

    assert out.shape == (B, H, W, C), out.shape
    assert out.dtype == jnp.float32
    assert bool(jnp.all(jnp.isfinite(out)))

    ref = _reference_numpy(np.asarray(moving), np.asarray(deform))
    np.testing.assert_allclose(np.asarray(out), ref, rtol=1e-4, atol=1e-4)

    print("KERNEL_OK")
</pallas_src>

<mosaic_0001>
module attributes {stable_mosaic.version = 11 : i64} {
  func.func @_warp_kernel(%arg0: i32, %arg1: i32, %arg2: memref<1x64x16xf32, #tpu.memory_space<vmem>>, %arg3: memref<1x2x256xf32, #tpu.memory_space<vmem>>, %arg4: memref<1x4x256xf32, #tpu.memory_space<vmem>>) attributes {dimension_semantics = [#tpu.dimension_semantics<parallel>, #tpu.dimension_semantics<parallel>], iteration_bounds = array<i64: 2, 1>, scalar_prefetch = 0 : i64, scratch_operands = 0 : i64, tpu.core_type = #tpu.core_type<tc>, window_params = [{transform_indices = @transform_0, window_bounds = array<i64: 1, 64, 16>}, {transform_indices = @transform_1, window_bounds = array<i64: 1, 2, 256>}, {transform_indices = @transform_2, window_bounds = array<i64: 1, 4, 256>}]} {
    %c0 = arith.constant 0 : index
    %c0_0 = arith.constant 0 : index
    %c0_1 = arith.constant 0 : index
    %0 = vector.load %arg3[%c0, %c0_0, %c0_1] : memref<1x2x256xf32, #tpu.memory_space<vmem>>, vector<1x2x256xf32>
    %1 = vector.shape_cast %0 : vector<1x2x256xf32> to vector<2x256xf32>
    %2 = vector.extract_strided_slice %1 {offsets = [0, 0], sizes = [1, 256], strides = [1, 1]} : vector<2x256xf32> to vector<1x256xf32>
    %cst = arith.constant 1.000000e+00 : f32
    %3 = vector.broadcast %cst : f32 to vector<1x256xf32>
    %4 = arith.addf %2, %3 : vector<1x256xf32>
    %5 = vector.extract_strided_slice %1 {offsets = [1, 0], sizes = [1, 256], strides = [1, 1]} : vector<2x256xf32> to vector<1x256xf32>
    %cst_2 = arith.constant 1.000000e+00 : f32
    %6 = vector.broadcast %cst_2 : f32 to vector<1x256xf32>
    %7 = arith.addf %5, %6 : vector<1x256xf32>
    %8 = math.floor %4 : vector<1x256xf32>
    %cst_3 = arith.constant 0.000000e+00 : f32
    %cst_4 = arith.constant 1.700000e+01 : f32
    %9 = vector.broadcast %cst_3 : f32 to vector<1x256xf32>
    %10 = arith.maximumf %9, %8 : vector<1x256xf32>
    %11 = vector.broadcast %cst_4 : f32 to vector<1x256xf32>
    %12 = arith.minimumf %11, %10 : vector<1x256xf32>
    %13 = math.floor %4 : vector<1x256xf32>
    %cst_5 = arith.constant 1.000000e+00 : f32
    %14 = vector.broadcast %cst_5 : f32 to vector<1x256xf32>
    %15 = arith.addf %13, %14 : vector<1x256xf32>
    %cst_6 = arith.constant 0.000000e+00 : f32
    %cst_7 = arith.constant 1.700000e+01 : f32
    %16 = vector.broadcast %cst_6 : f32 to vector<1x256xf32>
    %17 = arith.maximumf %16, %15 : vector<1x256xf32>
    %18 = vector.broadcast %cst_7 : f32 to vector<1x256xf32>
    %19 = arith.minimumf %18, %17 : vector<1x256xf32>
    %20 = math.floor %7 : vector<1x256xf32>
    %cst_8 = arith.constant 0.000000e+00 : f32
    %cst_9 = arith.constant 1.700000e+01 : f32
    %21 = vector.broadcast %cst_8 : f32 to vector<1x256xf32>
    %22 = arith.maximumf %21, %20 : vector<1x256xf32>
    %23 = vector.broadcast %cst_9 : f32 to vector<1x256xf32>
    %24 = arith.minimumf %23, %22 : vector<1x256xf32>
    %25 = math.floor %7 : vector<1x256xf32>
    %cst_10 = arith.constant 1.000000e+00 : f32
    %26 = vector.broadcast %cst_10 : f32 to vector<1x256xf32>
    %27 = arith.addf %25, %26 : vector<1x256xf32>
    %cst_11 = arith.constant 0.000000e+00 : f32
    %cst_12 = arith.constant 1.700000e+01 : f32
    %28 = vector.broadcast %cst_11 : f32 to vector<1x256xf32>
    %29 = arith.maximumf %28, %27 : vector<1x256xf32>
    %30 = vector.broadcast %cst_12 : f32 to vector<1x256xf32>
    %31 = arith.minimumf %30, %29 : vector<1x256xf32>
    %32 = arith.subf %19, %4 : vector<1x256xf32>
    %33 = arith.subf %31, %7 : vector<1x256xf32>
    %34 = arith.fptosi %24 : vector<1x256xf32> to vector<1x256xi32>
    %c1_i32 = arith.constant 1 : i32
    %35 = vector.broadcast %c1_i32 : i32 to vector<1x256xi32>
    %36 = arith.subi %34, %35 : vector<1x256xi32>
    %37 = arith.fptosi %31 : vector<1x256xf32> to vector<1x256xi32>
    %c1_i32_13 = arith.constant 1 : i32
    %38 = vector.broadcast %c1_i32_13 : i32 to vector<1x256xi32>
    %39 = arith.subi %37, %38 : vector<1x256xi32>
    %40 = arith.fptosi %12 : vector<1x256xf32> to vector<1x256xi32>
    %c1_i32_14 = arith.constant 1 : i32
    %41 = vector.broadcast %c1_i32_14 : i32 to vector<1x256xi32>
    %42 = arith.subi %40, %41 : vector<1x256xi32>
    %43 = arith.fptosi %19 : vector<1x256xf32> to vector<1x256xi32>
    %c1_i32_15 = arith.constant 1 : i32
    %44 = vector.broadcast %c1_i32_15 : i32 to vector<1x256xi32>
    %45 = arith.subi %43, %44 : vector<1x256xi32>
    %46 = tpu.iota {dimensions = array<i32: 0>} : vector<16x1xi32>
    %47 = tpu.iota {dimensions = array<i32: 0>} : vector<16x1xi32>
    %48 = vector.broadcast %46 : vector<16x1xi32> to vector<16x256xi32>
    %49 = vector.broadcast %36 : vector<1x256xi32> to vector<16x256xi32>
    %50 = arith.cmpi eq, %48, %49 : vector<16x256xi32>
    %51 = arith.extui %50 : vector<16x256xi1> to vector<16x256xi32>
    %52 = arith.sitofp %51 : vector<16x256xi32> to vector<16x256xf32>
    %53 = vector.broadcast %33 : vector<1x256xf32> to vector<16x256xf32>
    %54 = arith.mulf %53, %52 : vector<16x256xf32>
    %cst_16 = arith.constant 1.000000e+00 : f32
    %55 = vector.broadcast %cst_16 : f32 to vector<1x256xf32>
    %56 = arith.subf %55, %33 : vector<1x256xf32>
    %57 = vector.broadcast %46 : vector<16x1xi32> to vector<16x256xi32>
    %58 = vector.broadcast %39 : vector<1x256xi32> to vector<16x256xi32>
    %59 = arith.cmpi eq, %57, %58 : vector<16x256xi32>
    %60 = arith.extui %59 : vector<16x256xi1> to vector<16x256xi32>
    %61 = arith.sitofp %60 : vector<16x256xi32> to vector<16x256xf32>
    %62 = vector.broadcast %56 : vector<1x256xf32> to vector<16x256xf32>
    %63 = arith.mulf %62, %61 : vector<16x256xf32>
    %64 = arith.addf %54, %63 : vector<16x256xf32>
    %65 = vector.broadcast %47 : vector<16x1xi32> to vector<16x256xi32>
    %66 = vector.broadcast %42 : vector<1x256xi32> to vector<16x256xi32>
    %67 = arith.cmpi eq, %65, %66 : vector<16x256xi32>
    %68 = arith.extui %67 : vector<16x256xi1> to vector<16x256xi32>
    %69 = arith.sitofp %68 : vector<16x256xi32> to vector<16x256xf32>
    %70 = vector.broadcast %32 : vector<1x256xf32> to vector<16x256xf32>
    %71 = arith.mulf %70, %69 : vector<16x256xf32>
    %cst_17 = arith.constant 1.000000e+00 : f32
    %72 = vector.broadcast %cst_17 : f32 to vector<1x256xf32>
    %73 = arith.subf %72, %32 : vector<1x256xf32>
    %74 = vector.broadcast %47 : vector<16x1xi32> to vector<16x256xi32>
    %75 = vector.broadcast %45 : vector<1x256xi32> to vector<16x256xi32>
    %76 = arith.cmpi eq, %74, %75 : vector<16x256xi32>
    %77 = arith.extui %76 : vector<16x256xi1> to vector<16x256xi32>
    %78 = arith.sitofp %77 : vector<16x256xi32> to vector<16x256xf32>
    %79 = vector.broadcast %73 : vector<1x256xf32> to vector<16x256xf32>
    %80 = arith.mulf %79, %78 : vector<16x256xf32>
    %81 = arith.addf %71, %80 : vector<16x256xf32>
    %c0_18 = arith.constant 0 : index
    %c0_19 = arith.constant 0 : index
    %c0_20 = arith.constant 0 : index
    %82 = vector.load %arg2[%c0_18, %c0_19, %c0_20] : memref<1x64x16xf32, #tpu.memory_space<vmem>>, vector<1x64x16xf32>
    %83 = vector.shape_cast %82 : vector<1x64x16xf32> to vector<64x16xf32>
    %cst_21 = arith.constant dense<0.000000e+00> : vector<64x256xf32>
    %84 = tpu.matmul %83, %64, %cst_21 {dimension_numbers = #tpu.dot_dimension_numbers<[1], [0], [0], [1], [0, 0, 1, 1], [], []>, precision = #tpu.contract_precision<fp32>} : vector<64x16xf32>, vector<16x256xf32>, vector<64x256xf32> -> vector<64x256xf32>
    %85 = vector.extract_strided_slice %84 {offsets = [0, 0], sizes = [16, 256], strides = [1, 1]} : vector<64x256xf32> to vector<16x256xf32>
    %86 = arith.mulf %85, %81 : vector<16x256xf32>
    %cst_22 = arith.constant dense<0.000000e+00> : vector<256xf32>
    %87 = vector.multi_reduction <add>, %86, %cst_22 [0] : vector<16x256xf32> to vector<256xf32>
    %88 = vector.shape_cast %87 : vector<256xf32> to vector<1x256xf32>
    %89 = vector.extract_strided_slice %84 {offsets = [16, 0], sizes = [16, 256], strides = [1, 1]} : vector<64x256xf32> to vector<16x256xf32>
    %90 = arith.mulf %89, %81 : vector<16x256xf32>
    %cst_23 = arith.constant dense<0.000000e+00> : vector<256xf32>
    %91 = vector.multi_reduction <add>, %90, %cst_23 [0] : vector<16x256xf32> to vector<256xf32>
    %92 = vector.shape_cast %91 : vector<256xf32> to vector<1x256xf32>
    %93 = vector.extract_strided_slice %84 {offsets = [32, 0], sizes = [16, 256], strides = [1, 1]} : vector<64x256xf32> to vector<16x256xf32>
    %94 = arith.mulf %93, %81 : vector<16x256xf32>
    %cst_24 = arith.constant dense<0.000000e+00> : vector<256xf32>
    %95 = vector.multi_reduction <add>, %94, %cst_24 [0] : vector<16x256xf32> to vector<256xf32>
    %96 = vector.shape_cast %95 : vector<256xf32> to vector<1x256xf32>
    %97 = vector.extract_strided_slice %84 {offsets = [48, 0], sizes = [16, 256], strides = [1, 1]} : vector<64x256xf32> to vector<16x256xf32>
    %98 = arith.mulf %97, %81 : vector<16x256xf32>
    %cst_25 = arith.constant dense<0.000000e+00> : vector<256xf32>
    %99 = vector.multi_reduction <add>, %98, %cst_25 [0] : vector<16x256xf32> to vector<256xf32>
    %100 = vector.shape_cast %99 : vector<256xf32> to vector<1x256xf32>
    %101 = tpu.concatenate %88, %92, %96, %100 in 0 : vector<1x256xf32>, vector<1x256xf32>, vector<1x256xf32>, vector<1x256xf32> -> vector<4x256xf32>
    %c0_26 = arith.constant 0 : index
    %c0_27 = arith.constant 0 : index
    %c0_28 = arith.constant 0 : index
    %102 = vector.load %arg4[%c0_26, %c0_27, %c0_28] : memref<1x4x256xf32, #tpu.memory_space<vmem>>, vector<1x4x256xf32>
    %103 = vector.shape_cast %102 : vector<1x4x256xf32> to vector<4x256xf32>
    %104 = vector.shape_cast %101 : vector<4x256xf32> to vector<1x4x256xf32>
    tpu.vector_store %arg4[%c0_26, %c0_27, %c0_28], %104 {strides = array<i32>} : memref<1x4x256xf32, #tpu.memory_space<vmem>>, vector<1x4x256xf32>,
    return
  }
  func.func @transform_0(%arg0: i32, %arg1: i32) -> (i32, i32, i32) {
    %c0_i32 = arith.constant 0 : i32
    %c0_i32_0 = arith.constant 0 : i32
    %c0_i32_1 = arith.constant 0 : i32
    return %arg0, %c0_i32, %c0_i32_0 : i32, i32, i32
  }
  func.func @transform_1(%arg0: i32, %arg1: i32) -> (i32, i32, i32) {
    %c0_i32 = arith.constant 0 : i32
    %c0_i32_0 = arith.constant 0 : i32
    return %arg0, %c0_i32, %arg1 : i32, i32, i32
  }
  func.func @transform_2(%arg0: i32, %arg1: i32) -> (i32, i32, i32) {
    %c0_i32 = arith.constant 0 : i32
    %c0_i32_0 = arith.constant 0 : i32
    return %arg0, %c0_i32, %arg1 : i32, i32, i32
  }
}

</mosaic_0001>

<bundles_post_ra>
// kernel: spatial_transformation.1
= control target key start
LH: loop header
LB: loop body
LE: loop exit
PB: predicated region body
PF: predicated region fallthrough
CT: control target
= control target key end

     0   :  { %s1689_s9 = smov 0   ;;  %s1691_s10 = smov 0   ;;  %s1995_s0 = inlined_call_operand.vmem [shape: f32[2,64,16], index: 0, kind: input, shape index: {}]   ;;  %s1996_s1 = inlined_call_operand.vmem [shape: f32[2,2,256], index: 1, kind: input, shape index: {}]   ;;  %s1997_s2 = inlined_call_operand.vmem [shape: f32[2,4,256], index: 2, kind: output, shape index: {}]  }
   0x1   :  { %s1693_s11 = smov 0  }
   0x2 LB: > { %s24_s12 = sadd.s32 1, %s1667_s10  ;;  %p1486_p0 = scmp.ge.s32.totalorder %s1671_s11, 1  ;;  %s1671_s11 = sphi %s1693_s11, %s12_s11   ;;  %s1667_s10 = sphi %s1691_s10, %s1999_s10   ;;  %s1663_s9 = sphi %s1689_s9, %s1998_s9  }
   0x3   : > { %p26_p1 = scmp.ge.s32.totalorder %s24_s12, 2  ;;  %p143_p2 = scmp.lt.s32.totalorder %s1671_s11, 3 }
   0x5   : > { %s2001_s12 = smov (%p26_p1, %s24_s12), 0  ;;  %p144_p3 = pnand %p1486_p0, %p143_p2 }
   0x6   : > { %p178_p4 = scmp.lt.s32.totalorder (!%p144_p3), %s1663_s9, 1  ;;  %v1673_v0 = vmov (!%p144_p3), 0.0   ;;  %v216_v3 = vlaneseq (!%p144_p3)  ;;  %vm438_vm0 = vcmask (!%p144_p3), 130048  }
   0x7   : > { %147 = sbr.rel (%p144_p3) target bundleno = 381 (0x17d), region = 28  ;;  %531 = vmatprep.mubr.f32.mxu1 (!%p144_p3), %v1673_v0  ;;  %966 = vmatprep.mubr.f32.mxu0 (!%p144_p3), %v1673_v0 }
   0x8   : > { %v1721_v7 = vshrl.u32 (!%p144_p3), %v216_v3, 7 }
   0xa   : > { %v225_v16 = vsub.s32 (!%p144_p3), 3, %v1721_v7  ;;  %v221_v21 = vsub.s32 (!%p144_p3), 1, %v1721_v7  ;;  %v1743_v29 = vadd.s32 (!%p144_p3), 8, %v1721_v7 }
   0xe   : > { %s2003_s9 = smov (!%p178_p4, %s1663_s9), 1 }
   0xf   : > { %s1514_s13 = sshll.u32 %s2003_s9, 2  ;;  %s1513_s17 = sshll.u32 %s2003_s9, 6 }
  0x10   : > { %s191_s16 = scalar_lea.vmem %s1996_s1, %s1514_s13  ;;  %s1719_s20 = scalar_lea.vmem %s1995_s0, %s1513_s17 }
  0x11   : > { %v203_v1 = vld [vmem:[%s191_s16] sm:$0xf]  ;;  %v431_v11 = vld [vmem:[%s1719_s20 + $0x8] sm:$0xff]  ;;  %v432_v15 = vld [vmem:[%s1719_s20 + $0x10] sm:$0xff]  ;;  %s1515_s21 = sshll.u32 %s2003_s9, 3 }
  0x12   : > { %v204_v2 = vadd.f32 1.0, %v203_v1  ;;  %v430_v8 = vld [vmem:[%s1719_s20] sm:$0xff]  ;;  %v443_v20 = vsel %vm438_vm0, %v431_v11, 0  ;;  %v446_v23 = vsel %vm438_vm0, %v432_v15, 0  ;;  %v433_v24 = vld [vmem:[%s1719_s20 + $0x18] sm:$0xff]  ;;  %s201_s24 = scalar_lea.vmem %s1997_s2, %s1515_s21 }
  0x13   : > { %v440_v14 = vsel %vm438_vm0, %v430_v8, 0  ;;  %v1746_v31 = vand.u32 4294901760, %v443_v20  ;;  %v1753_v35 = vsel %vm438_vm0, %v433_v24, 0  ;;  %v1760_v39 = vand.u32 4294901760, %v446_v23  ;;  %v434_v1 = vld [vmem:[%s1719_s20 + $0x20] sm:$0xff] }
  0x14   : > { %v205_v4 = vfloor.f32 %v204_v2  ;;  %v1732_v22 = vand.u32 4294901760, %v440_v14 }
  0x15   : > { %v1778_v61 = vsub.f32 %v443_v20, %v1746_v31 }
  0x16   : > { %v206_v5 = vmax.f32 %v205_v4, 0.0  ;;  %v208_v6 = vadd.f32 1.0, %v205_v4  ;;  %v1758_v38 = vsub.f32 %v440_v14, %v1732_v22  ;;  %v435_v14 = vld [vmem:[%s1719_s20 + $0x28] sm:$0xff] }
  0x18   : > { %v207_v9 = vmin.f32 %v206_v5, 17.0  ;;  %v209_v10 = vmax.f32 %v208_v6, 0.0  ;;  %v534_v60 = vand.u32 4294901760, %v1758_v38 }
  0x1a   : > { %v210_v12 = vmin.f32 %v209_v10, 17.0  ;;  %v1620_v13 = vtrunc.f32 %v207_v9  ;;  %v1786_v9 = vand.u32 4294901760, %v1753_v35  ;;  %v535_v24 = vsub.f32 %v1758_v38, %v534_v60 }
  0x1c   : > { %v1728_v17 = vsub.f32 %v210_v12, %v204_v2  ;;  %v1621_v18 = vcvt.f32.s32 %v1620_v13  ;;  %v1622_v19 = vtrunc.f32 %v210_v12  ;;  %v1789_v12 = vsub.f32 %v446_v23, %v1760_v39 }
  0x1d   : > { %v452_v13 = vsel %vm438_vm0, %v434_v1, 0 }
  0x1e   : > { %v1736_v25 = vadd.s32 4294967295, %v1621_v18  ;;  %v1623_v26 = vcvt.f32.s32 %v1622_v19  ;;  %v255_v27 = vrot.slane %v1728_v17, %v225_v16  ;;  %v1740_v28 = vsub.f32 1.0, %v1728_v17 }
  0x1f   : > { %v251_v30 = vrot.slane %v1728_v17, %v221_v21  ;;  %v545_v18 = vand.u32 4294901760, %v1778_v61 }
  0x20   : > { %v1748_v32 = vadd.s32 4294967295, %v1623_v26  ;;  %v226_v33 = vrot.slane %v1736_v25, %v225_v16  ;;  %v307_v34 = vrot.slane %v1740_v28, %v225_v16  ;;  %v222_v36 = vrot.slane %v1736_v25, %v221_v21 }
  0x21   : > { %v303_v37 = vrot.slane %v1740_v28, %v221_v21  ;;  %v265_v41 = vrot.slane %v255_v27, %v221_v21  ;;  %v261_v46 = vrot.slane %v251_v30, %v221_v21  ;;  %v1795_v30 = vand.u32 4294901760, %v452_v13 }
  0x22   : > { %v234_v40 = vrot.slane %v226_v33, %v221_v21  ;;  %v278_v42 = vrot.slane %v1748_v32, %v225_v16  ;;  %v274_v43 = vrot.slane %v1748_v32, %v221_v21  ;;  %v317_v44 = vrot.slane %v307_v34, %v221_v21 }
  0x23   : > { %v230_v45 = vrot.slane %v222_v36, %v221_v21  ;;  %v313_v47 = vrot.slane %v303_v37, %v221_v21  ;;  %v455_v33 = vsel %vm438_vm0, %v435_v14, 0  ;;  %v556_v36 = vand.u32 4294901760, %v1789_v12 }
  0x24   : > { %vm236_vm1 = vcmp.eq.s32.totalorder %v1721_v7, %v234_v40  ;;  %vm238_vm2 = vcmp.eq.s32.totalorder %v1743_v29, %v234_v40  ;;  %v286_v48 = vrot.slane %v278_v42, %v221_v21  ;;  %v282_v49 = vrot.slane %v274_v43, %v221_v21 }
  0x25   : > { %v1496_v50 = vsel %vm236_vm1, 1.0, %v1673_v0  ;;  %v1498_v51 = vsel %vm238_vm2, 1.0, %v1673_v0  ;;  %vm235_vm3 = vcmp.eq.s32.totalorder %v1721_v7, %v230_v45  ;;  %vm237_vm4 = vcmp.eq.s32.totalorder %v1743_v29, %v230_v45 }
  0x26   : > { %v267_v52 = vmul.f32 %v1496_v50, %v265_v41  ;;  %v269_v53 = vmul.f32 %v1498_v51, %v265_v41  ;;  %vm288_vm5 = vcmp.eq.s32.totalorder %v1721_v7, %v286_v48  ;;  %vm290_vm6 = vcmp.eq.s32.totalorder %v1743_v29, %v286_v48 }
  0x27   : > { %v1500_v54 = vsel %vm288_vm5, 1.0, %v1673_v0  ;;  %v1502_v55 = vsel %vm290_vm6, 1.0, %v1673_v0  ;;  %v1495_v56 = vsel %vm235_vm3, 1.0, %v1673_v0  ;;  %v1497_v57 = vsel %vm237_vm4, 1.0, %v1673_v0 }
  0x28   : > { %v319_v58 = vmul.f32 %v1500_v54, %v317_v44  ;;  %v321_v59 = vmul.f32 %v1502_v55, %v317_v44  ;;  %v266_v62 = vmul.f32 %v1495_v56, %v261_v46  ;;  %v268_v63 = vmul.f32 %v1497_v57, %v261_v46 }
  0x29   : > { %vm287_vm7 = vcmp.eq.s32.totalorder %v1721_v7, %v282_v49  ;;  %vm289_vm8 = vcmp.eq.s32.totalorder %v1743_v29, %v282_v49  ;;  %v1801_v37 = vsub.f32 %v1753_v35, %v1786_v9  ;;  %v546_v43 = vsub.f32 %v1778_v61, %v545_v18 }
  0x2a   : > { %v323_v2 = vadd.f32 %v319_v58, %v267_v52  ;;  %v325_v3 = vadd.f32 %v321_v59, %v269_v53  ;;  %v1499_v4 = vsel %vm287_vm7, 1.0, %v1673_v0  ;;  %v1501_v5 = vsel %vm289_vm8, 1.0, %v1673_v0  ;;  %v436_v52 = vld [vmem:[%s1719_s20 + $0x30] sm:$0xff] }
  0x2b   : > { %v318_v6 = vmul.f32 %v1499_v4, %v313_v47  ;;  %v320_v8 = vmul.f32 %v1501_v5, %v313_v47  ;;  %v536_v44 = vand.u32 4294901760, %v535_v24  ;;  %v1815_v51 = vsub.f32 %v452_v13, %v1795_v30 }
  0x2c   : > { %v463_v10 = vand.u32 4294901760, %v323_v2  ;;  %v467_v11 = vand.u32 4294901760, %v325_v3  ;;  %v1820_v56 = vand.u32 4294901760, %v455_v33  ;;  %v547_v57 = vand.u32 4294901760, %v546_v43 }
  0x2d   : > { %v322_v15 = vadd.f32 %v318_v6, %v266_v62  ;;  %v324_v16 = vadd.f32 %v320_v8, %v268_v63  ;;  %v557_v59 = vsub.f32 %v1789_v12, %v556_v36  ;;  %v567_v62 = vand.u32 4294901760, %v1801_v37 }
  0x2e   : > { %v1516_v19 = vpack.c.bf16 %v467_v11, %v463_v10  ;;  %v621_v20 = vsub.f32 %v323_v2, %v463_v10  ;;  %v633_v21 = vsub.f32 %v325_v3, %v467_v11  ;;  %v458_v2 = vsel %vm438_vm0, %v436_v52, 0  ;;  %v437_v3 = vld [vmem:[%s1719_s20 + $0x38] sm:$0xff] }
  0x2f   : > { %v465_v26 = vand.u32 4294901760, %v322_v15  ;;  %v469_v27 = vand.u32 4294901760, %v324_v16  ;;  %v558_v6 = vand.u32 4294901760, %v557_v59  ;;  %v568_v8 = vsub.f32 %v1801_v37, %v567_v62 }
  0x30   : > { %1517 = vmatprep.subr.bf16.mxu1 %v1516_v19  ;;  %1529 = vmatprep.subr.bf16.mxu0 %v1516_v19  ;;  %v622_v23 = vand.u32 4294901760, %v621_v20  ;;  %v634_v34 = vand.u32 4294901760, %v633_v21  ;;  %v1524_v4 = vpack.c.bf16 %v633_v21, %v621_v20  ;;  %v1831_v10 = vsub.f32 %v455_v33, %v1820_v56 }
  0x31   : > { %v1803_v40 = vpack.c.bf16 %v469_v27, %v465_v26  ;;  %v1805_v41 = vsub.f32 %v322_v15, %v465_v26  ;;  %v1807_v42 = vsub.f32 %v324_v16, %v469_v27  ;;  %v1833_v11 = vand.u32 4294901760, %v458_v2 }
  0x32   : > { %v623_v45 = vsub.f32 %v621_v20, %v622_v23  ;;  %v635_v46 = vsub.f32 %v633_v21, %v634_v34  ;;  %v1532_v47 = vpack.c.bf16 %v634_v34, %v622_v23  ;;  %v461_v13 = vsel %vm438_vm0, %v437_v3, 0 }
  0x33   : > { %1519 = vmatpush1.bf16.msra.mxu1 %v1803_v40  ;;  %1531 = vmatpush1.bf16.msra.mxu0 %v1803_v40  ;;  %v628_v35 = vand.u32 4294901760, %v1805_v41  ;;  %v640_v48 = vand.u32 4294901760, %v1807_v42  ;;  %v569_v15 = vand.u32 4294901760, %v568_v8  ;;  %v589_v16 = vand.u32 4294901760, %v1831_v10 }
  0x34   : > { %v624_v49 = vand.u32 4294901760, %v623_v45  ;;  %v636_v50 = vand.u32 4294901760, %v635_v46  ;;  %1533 = vmatprep.subr.bf16.mxu0 %v1532_v47  ;;  %vm1369_vm1 = vcmask 1040384   ;;  %vm1372_vm2 = vcmask 1041408  }
  0x35   : > { %v629_v53 = vsub.f32 %v1805_v41, %v628_v35  ;;  %v641_v54 = vsub.f32 %v1807_v42, %v640_v48  ;;  %v1534_v55 = vpack.c.bf16 %v640_v48, %v628_v35  ;;  %v590_v21 = vsub.f32 %v1831_v10, %v589_v16 }
  0x36   : > { %537 = vmatmul.mubr.f32.vlgmr.msra.gmra.mrb[0].mxu1 %v536_v44  ;;  %970 = vmatmul.mubr.f32.vlgmr.msra.gmra.mrb[0].mxu0 %v534_v60  ;;  %v1520_v58 = vpack.c.bf16 %v636_v50, %v624_v49  ;;  %v578_v60 = vand.u32 4294901760, %v1815_v51  ;;  %v1526_v44 = vpack.c.bf16 %v1807_v42, %v1805_v41  ;;  %vm1375_vm3 = vcmask 1042432  }
  0x37   : > { %542 = vmatprep.mubr.f32.mxu1 %v1673_v0  ;;  %975 = vmatprep.mubr.f32.mxu0 %v1673_v0  ;;  %v630_v63 = vand.u32 4294901760, %v629_v53  ;;  %v642_v1 = vand.u32 4294901760, %v641_v54  ;;  %v591_v27 = vand.u32 4294901760, %v590_v21 }
  0x38   : > { %1521 = vmatprep.subr.bf16.mxu1 %v1520_v58  ;;  %1535 = vmatpush1.bf16.msra.mxu0 %v1534_v55  ;;  %v579_v14 = vsub.f32 %v1815_v51, %v578_v60 }
  0x39   : > { %v1522_v5 = vpack.c.bf16 %v642_v1, %v630_v63  ;;  %1537 = vmatprep.subr.bf16.mxu0 %v1516_v19  ;;  %v1843_v19 = vand.u32 4294901760, %v461_v13 }
  0x3a   : > { %548 = vmatmul.mubr.f32.gmra.mrb[2].mxu1 %v547_v57  ;;  %979 = vmatmul.mubr.f32.gmra.mrb[2].mxu0 %v545_v18  ;;  %v1841_v18 = vsub.f32 %v458_v2, %v1833_v11  ;;  %v580_v20 = vand.u32 4294901760, %v579_v14 }
  0x3b   : > { %1523 = vmatpush1.bf16.msra.mxu1 %v1522_v5  ;;  %553 = vmatprep.mubr.f32.mxu1 %v1673_v0  ;;  %v1850_v26 = vsub.f32 %v461_v13, %v1843_v19 }
  0x3c   : > { %984 = vmatprep.mubr.f32.mxu0 %v1673_v0  ;;  %1525 = vmatprep.subr.bf16.mxu1 %v1524_v4  ;;  %v600_v24 = vand.u32 4294901760, %v1841_v18 }
  0x3d   : > { %v611_v23 = vand.u32 4294901760, %v1850_v26 }
  0x3e   : > { %559 = vmatmul.mubr.f32.gmra.mrb[4].mxu1 %v558_v6  ;;  %988 = vmatmul.mubr.f32.gmra.mrb[4].mxu0 %v556_v36  ;;  %v601_v33 = vsub.f32 %v1841_v18, %v600_v24 }
  0x3f   : > { %564 = vmatprep.mubr.f32.mxu1 %v1673_v0  ;;  %993 = vmatprep.mubr.f32.mxu0 %v1673_v0  ;;  %v612_v36 = vsub.f32 %v1850_v26, %v611_v23 }
  0x40   : > { %v602_v34 = vand.u32 4294901760, %v601_v33 }
  0x41   : > { %v613_v43 = vand.u32 4294901760, %v612_v36 }
  0x42   : > { %570 = vmatmul.mubr.f32.gmra.mrb[6].mxu1 %v569_v15  ;;  %997 = vmatmul.mubr.f32.gmra.mrb[6].mxu0 %v567_v62 }
  0x43   : > { %575 = vmatprep.mubr.f32.mxu1 %v1673_v0  ;;  %1002 = vmatprep.mubr.f32.mxu0 %v1673_v0 }
  0x46   : > { %581 = vmatmul.mubr.f32.gmra.mrb[8].mxu1 %v580_v20  ;;  %1006 = vmatmul.mubr.f32.gmra.mrb[8].mxu0 %v578_v60 }
  0x47   : > { %586 = vmatprep.mubr.f32.mxu1 %v1673_v0  ;;  %1011 = vmatprep.mubr.f32.mxu0 %v1673_v0 }
  0x4a   : > { %592 = vmatmul.mubr.f32.gmra.mrb[10].mxu1 %v591_v27  ;;  %1015 = vmatmul.mubr.f32.gmra.mrb[10].mxu0 %v589_v16 }
  0x4b   : > { %597 = vmatprep.mubr.f32.mxu1 %v1673_v0  ;;  %1020 = vmatprep.mubr.f32.mxu0 %v1673_v0 }
  0x4e   : > { %603 = vmatmul.mubr.f32.gmra.mrb[12].mxu1 %v602_v34  ;;  %1024 = vmatmul.mubr.f32.gmra.mrb[12].mxu0 %v600_v24 }
  0x4f   : > { %608 = vmatprep.mubr.f32.mxu1 %v1673_v0  ;;  %1029 = vmatprep.mubr.f32.mxu0 %v1673_v0 }
  0x52   : > { %614 = vmatmul.mubr.f32.gmra.mrb[14].mxu1 %v613_v43  ;;  %1033 = vmatmul.mubr.f32.gmra.mrb[14].mxu0 %v611_v23 }
  0x53   : > { %704 = vmatprep.mubr.f32.mxu1 %v1673_v0  ;;  %1115 = vmatprep.mubr.f32.mxu0 %v1673_v0 }
  0x56   : > { %706 = vmatmul.mubr.f32.vlgmr.msra.gmra.mrb[0].mxu1 %v1732_v22  ;;  %1117 = vmatmul.mubr.f32.vlgmr.msra.gmra.mrb[0].mxu0 %v1732_v22 }
  0x57   : > { %711 = vmatprep.mubr.f32.mxu1 %v1673_v0  ;;  %1122 = vmatprep.mubr.f32.mxu0 %v1673_v0 }
  0x58   : > { %1527 = vmatpush1.bf16.msra.mxu1 %v1526_v44  ;;  %1539 = vmatpush1.bf16.msra.mxu0 %v1803_v40 }
  0x5a   : > { %713 = vmatmul.mubr.f32.gmra.mrb[2].mxu1 %v1746_v31  ;;  %1124 = vmatmul.mubr.f32.gmra.mrb[2].mxu0 %v1746_v31 }
  0x5b   : > { %718 = vmatprep.mubr.f32.mxu1 %v1673_v0  ;;  %1129 = vmatprep.mubr.f32.mxu0 %v1673_v0 }
  0x5e   : > { %720 = vmatmul.mubr.f32.gmra.mrb[4].mxu1 %v1760_v39  ;;  %1131 = vmatmul.mubr.f32.gmra.mrb[4].mxu0 %v1760_v39 }
  0x5f   : > { %725 = vmatprep.mubr.f32.mxu1 %v1673_v0  ;;  %1136 = vmatprep.mubr.f32.mxu0 %v1673_v0 }
  0x62   : > { %727 = vmatmul.mubr.f32.gmra.mrb[6].mxu1 %v1786_v9  ;;  %1138 = vmatmul.mubr.f32.gmra.mrb[6].mxu0 %v1786_v9 }
  0x63   : > { %732 = vmatprep.mubr.f32.mxu1 %v1673_v0  ;;  %1143 = vmatprep.mubr.f32.mxu0 %v1673_v0 }
  0x66   : > { %734 = vmatmul.mubr.f32.gmra.mrb[8].mxu1 %v1795_v30  ;;  %1145 = vmatmul.mubr.f32.gmra.mrb[8].mxu0 %v1795_v30 }
  0x67   : > { %739 = vmatprep.mubr.f32.mxu1 %v1673_v0  ;;  %1150 = vmatprep.mubr.f32.mxu0 %v1673_v0 }
  0x6a   : > { %741 = vmatmul.mubr.f32.gmra.mrb[10].mxu1 %v1820_v56  ;;  %1152 = vmatmul.mubr.f32.gmra.mrb[10].mxu0 %v1820_v56 }
  0x6b   : > { %746 = vmatprep.mubr.f32.mxu1 %v1673_v0  ;;  %1157 = vmatprep.mubr.f32.mxu0 %v1673_v0 }
  0x6e   : > { %748 = vmatmul.mubr.f32.gmra.mrb[12].mxu1 %v1833_v11  ;;  %1159 = vmatmul.mubr.f32.gmra.mrb[12].mxu0 %v1833_v11 }
  0x6f   : > { %753 = vmatprep.mubr.f32.mxu1 %v1673_v0  ;;  %1164 = vmatprep.mubr.f32.mxu0 %v1673_v0 }
  0x72   : > { %755 = vmatmul.mubr.f32.gmra.mrb[14].mxu1 %v1843_v19  ;;  %1166 = vmatmul.mubr.f32.gmra.mrb[14].mxu0 %v1843_v19 }
  0x73   : > { %833 = vmatprep.mubr.f32.mxu1 %v1673_v0  ;;  %1240 = vmatprep.mubr.f32.mxu0 %v1673_v0 }
  0x76   : > { %836 = vmatmul.mubr.f32.vlgmr.msra.gmra.mrb[0].mxu1 %v1758_v38  ;;  %1242 = vmatmul.mubr.f32.vlgmr.msra.gmra.mrb[0].mxu0 %v1732_v22  ;;  %v328_v22 = vsub.s32 0, %v1721_v7 }
  0x77   : > { %841 = vmatprep.mubr.f32.mxu1 %v1673_v0  ;;  %1247 = vmatprep.mubr.f32.mxu0 %v1673_v0 }
  0x78   : > { %v329_v38 = vrot.slane %v1736_v25, %v328_v22  ;;  %v357_v41 = vrot.slane %v1728_v17, %v328_v22  ;;  %v407_v42 = vrot.slane %v1740_v28, %v328_v22 }
  0x7a   : > { %844 = vmatmul.mubr.f32.gmra.mrb[2].mxu1 %v1778_v61  ;;  %1249 = vmatmul.mubr.f32.gmra.mrb[2].mxu0 %v1746_v31  ;;  %v332_v31 = vsub.s32 2, %v1721_v7 }
  0x7b   : > { %849 = vmatprep.mubr.f32.mxu1 %v1673_v0  ;;  %1254 = vmatprep.mubr.f32.mxu0 %v1673_v0 }
  0x7c   : > { %v333_v61 = vrot.slane %v1736_v25, %v332_v31  ;;  %v361_v45 = vrot.slane %v1728_v17, %v332_v31  ;;  %v411_v46 = vrot.slane %v1740_v28, %v332_v31  ;;  %v417_v17 = vrot.slane %v407_v42, %v328_v22 }
  0x7e   : > { %852 = vmatmul.mubr.f32.gmra.mrb[4].mxu1 %v1789_v12  ;;  %1256 = vmatmul.mubr.f32.gmra.mrb[4].mxu0 %v1760_v39  ;;  %v379_v39 = vrot.slane %v1748_v32, %v328_v22  ;;  %v337_v12 = vrot.slane %v329_v38, %v328_v22  ;;  %v371_v35 = vrot.slane %v361_v45, %v328_v22 }
  0x7f   : > { %857 = vmatprep.mubr.f32.mxu1 %v1673_v0  ;;  %1261 = vmatprep.mubr.f32.mxu0 %v1673_v0  ;;  %v421_v28 = vrot.slane %v411_v46, %v328_v22 }
  0x80   : > { %vm342_vm9 = vcmp.eq.s32.totalorder %v1721_v7, %v337_v12  ;;  %vm344_vm11 = vcmp.eq.s32.totalorder %v1743_v29, %v337_v12 }
  0x81   : > { %v1503_v25 = vsel %vm342_vm9, 1.0, %v1673_v0  ;;  %v1505_v48 = vsel %vm344_vm11, 1.0, %v1673_v0 }
  0x82   : > { %860 = vmatmul.mubr.f32.gmra.mrb[6].mxu1 %v1801_v37  ;;  %1263 = vmatmul.mubr.f32.gmra.mrb[6].mxu0 %v1786_v9  ;;  %v383_v9 = vrot.slane %v1748_v32, %v332_v31  ;;  %v341_v37 = vrot.slane %v333_v61, %v328_v22  ;;  %v367_v32 = vrot.slane %v357_v41, %v328_v22 }
  0x83   : > { %865 = vmatprep.mubr.f32.mxu1 %v1673_v0  ;;  %1268 = vmatprep.mubr.f32.mxu0 %v1673_v0 }
  0x84   : > { %v391_v40 = vrot.slane %v383_v9, %v328_v22  ;;  %vm343_vm13 = vcmp.eq.s32.totalorder %v1721_v7, %v341_v37  ;;  %vm345_vm15 = vcmp.eq.s32.totalorder %v1743_v29, %v341_v37  ;;  %v372_v52 = vmul.f32 %v1503_v25, %v367_v32 }
  0x85   : > { %v1504_v50 = vsel %vm343_vm13, 1.0, %v1673_v0  ;;  %v374_v54 = vmul.f32 %v1505_v48, %v367_v32 }
  0x86   : > { %868 = vmatmul.mubr.f32.gmra.mrb[8].mxu1 %v1815_v51  ;;  %1270 = vmatmul.mubr.f32.gmra.mrb[8].mxu0 %v1795_v30  ;;  %v387_v30 = vrot.slane %v379_v39, %v328_v22  ;;  %vm393_vm14 = vcmp.eq.s32.totalorder %v1721_v7, %v391_v40  ;;  %vm395_vm0 = vcmp.eq.s32.totalorder %v1743_v29, %v391_v40  ;;  %v1506_v51 = vsel %vm345_vm15, 1.0, %v1673_v0 }
  0x87   : > { %873 = vmatprep.mubr.f32.mxu1 %v1673_v0  ;;  %1275 = vmatprep.mubr.f32.mxu0 %v1673_v0  ;;  %v373_v58 = vmul.f32 %v1504_v50, %v371_v35  ;;  %v375_v62 = vmul.f32 %v1506_v51, %v371_v35 }
  0x88   : > { %vm392_vm10 = vcmp.eq.s32.totalorder %v1721_v7, %v387_v30  ;;  %vm394_vm12 = vcmp.eq.s32.totalorder %v1743_v29, %v387_v30  ;;  %v1508_v7 = vsel %vm393_vm14, 1.0, %v1673_v0  ;;  %v1510_v29 = vsel %vm395_vm0, 1.0, %v1673_v0 }
  0x89   : > { %v1507_v47 = vsel %vm392_vm10, 1.0, %v1673_v0  ;;  %v1509_v49 = vsel %vm394_vm12, 1.0, %v1673_v0  ;;  %v423_v59 = vmul.f32 %v1508_v7, %v421_v28  ;;  %v425_v63 = vmul.f32 %v1510_v29, %v421_v28 }
  0x8a   : > { %876 = vmatmul.mubr.f32.gmra.mrb[10].mxu1 %v1831_v10  ;;  %1277 = vmatmul.mubr.f32.gmra.mrb[10].mxu0 %v1820_v56  ;;  %v422_v53 = vmul.f32 %v1507_v47, %v417_v17  ;;  %v424_v55 = vmul.f32 %v1509_v49, %v417_v17 }
  0x8b   : > { %881 = vmatprep.mubr.f32.mxu1 %v1673_v0  ;;  %1282 = vmatprep.mubr.f32.mxu0 %v1673_v0  ;;  %v1960_v6 = vadd.f32 %v423_v59, %v373_v58  ;;  %v1962_v10 = vadd.f32 %v425_v63, %v375_v62 }
  0x8c   : > { %v1956_v5 = vadd.f32 %v422_v53, %v372_v52  ;;  %v1958_v60 = vadd.f32 %v424_v55, %v374_v54 }
  0x8e   : > { %884 = vmatmul.mubr.f32.gmra.mrb[12].mxu1 %v1841_v18  ;;  %1284 = vmatmul.mubr.f32.gmra.mrb[12].mxu0 %v1833_v11 }
  0x8f   : > { %889 = vmatprep.mubr.f32.mxu1 %v1673_v0  ;;  %1289 = vmatprep.mubr.f32.mxu0 %v1673_v0 }
  0x92   : > { %892 = vmatmul.mubr.f32.gmra.mrb[14].mxu1 %v1850_v26  ;;  %1291 = vmatmul.mubr.f32.gmra.mrb[14].mxu0 %v1843_v19 }
 0x149   : > { %v837_v56 = vpop.f32.mrb[0].mxu1  ;;  %v1243_v57 = vpop.f32.mrb[0].mxu0 }
 0x14a   : > { %v1540_v1 = vadd.f32 %v1243_v57, %v837_v56  ;;  %v839_v2 = vpop.f32.mrb[1].mxu1  ;;  %v1245_v3 = vpop.f32.mrb[1].mxu0 }
 0x14b   : > { %v1541_v4 = vadd.f32 %v1245_v3, %v839_v2 }
 0x14c   : > { %v1297_v16 = vmul.f32 %v1540_v1, %v1956_v5 }
 0x14d   : > { %v845_v0 = vpop.f32.mrb[2].mxu1  ;;  %v1250_v8 = vpop.f32.mrb[2].mxu0  ;;  %v1298_v19 = vmul.f32 %v1541_v4, %v1960_v6 }
 0x14e   : > { %v1542_v11 = vadd.f32 %v1250_v8, %v845_v0  ;;  %v847_v13 = vpop.f32.mrb[3].mxu1  ;;  %v1252_v14 = vpop.f32.mrb[3].mxu0 }
 0x14f   : > { %v1543_v15 = vadd.f32 %v1252_v14, %v847_v13 }
 0x150   : > { %v1299_v18 = vmul.f32 %v1542_v11, %v1958_v60 }
 0x151   : > { %v1300_v20 = vmul.f32 %v1543_v15, %v1962_v10  ;;  %v853_v21 = vpop.f32.mrb[4].mxu1  ;;  %v1257_v24 = vpop.f32.mrb[4].mxu0 }
 0x152   : > { %v1301_v26 = vadd.f32 %v1299_v18, %v1297_v16  ;;  %v1544_v27 = vadd.f32 %v1257_v24, %v853_v21  ;;  %v855_v33 = vpop.f32.mrb[5].mxu1  ;;  %v1259_v23 = vpop.f32.mrb[5].mxu0 }
 0x153   : > { %v1308_v34 = vadd.f32 %v1300_v20, %v1298_v19  ;;  %v1545_v36 = vadd.f32 %v1259_v23, %v855_v33 }
 0x154   : > { %v1302_v43 = vrot.slane %v1301_v26, 4  ;;  %v1315_v37 = vmul.f32 %v1544_v27, %v1956_v5 }
 0x155   : > { %v1309_v44 = vrot.slane %v1308_v34, 4  ;;  %v861_v22 = vpop.f32.mrb[6].mxu1  ;;  %v1264_v31 = vpop.f32.mrb[6].mxu0  ;;  %v1316_v41 = vmul.f32 %v1545_v36, %v1960_v6 }
 0x156   : > { %v1303_v38 = vadd.f32 %v1302_v43, %v1301_v26  ;;  %v1546_v39 = vadd.f32 %v1264_v31, %v861_v22  ;;  %v863_v61 = vpop.f32.mrb[7].mxu1  ;;  %v1266_v9 = vpop.f32.mrb[7].mxu0 }
 0x157   : > { %v1310_v12 = vadd.f32 %v1309_v44, %v1308_v34  ;;  %v1547_v30 = vadd.f32 %v1266_v9, %v863_v61 }
 0x158   : > { %v1317_v40 = vmul.f32 %v1546_v39, %v1958_v60  ;;  %v1304_v25 = vrot.slane %v1303_v38, 2 }
 0x159   : > { %v1318_v42 = vmul.f32 %v1547_v30, %v1962_v10  ;;  %v869_v45 = vpop.f32.mrb[8].mxu1  ;;  %v1271_v46 = vpop.f32.mrb[8].mxu0  ;;  %v1311_v28 = vrot.slane %v1310_v12, 2 }
 0x15a   : > { %v1319_v32 = vadd.f32 %v1317_v40, %v1315_v37  ;;  %v1548_v47 = vadd.f32 %v1271_v46, %v869_v45  ;;  %v871_v17 = vpop.f32.mrb[9].mxu1  ;;  %v1273_v35 = vpop.f32.mrb[9].mxu0  ;;  %v1305_v52 = vadd.f32 %v1304_v25, %v1303_v38 }
 0x15b   : > { %v1326_v48 = vadd.f32 %v1318_v42, %v1316_v41  ;;  %v1549_v49 = vadd.f32 %v1273_v35, %v871_v17  ;;  %v1312_v57 = vadd.f32 %v1311_v28, %v1310_v12 }
 0x15c   : > { %v1320_v50 = vrot.slane %v1319_v32, 4  ;;  %v1333_v63 = vmul.f32 %v1548_v47, %v1956_v5  ;;  %v1306_v11 = vrot.slane %v1305_v52, 1 }
 0x15d   : > { %v1327_v7 = vrot.slane %v1326_v48, 4  ;;  %v877_v51 = vpop.f32.mrb[10].mxu1  ;;  %v1278_v29 = vpop.f32.mrb[10].mxu0  ;;  %v1334_v3 = vmul.f32 %v1549_v49, %v1960_v6  ;;  %v1313_v19 = vrot.slane %v1312_v57, 1 }
 0x15e   : > { %v1321_v53 = vadd.f32 %v1320_v50, %v1319_v32  ;;  %v1550_v54 = vadd.f32 %v1278_v29, %v877_v51  ;;  %v879_v55 = vpop.f32.mrb[11].mxu1  ;;  %v1280_v56 = vpop.f32.mrb[11].mxu0  ;;  %v1307_v43 = vadd.f32 %v1306_v11, %v1305_v52 }
 0x15f   : > { %v1328_v58 = vadd.f32 %v1327_v7, %v1326_v48  ;;  %v1551_v59 = vadd.f32 %v1280_v56, %v879_v55  ;;  %v1314_v61 = vadd.f32 %v1313_v19, %v1312_v57 }
 0x160   : > { %v1322_v62 = vrot.slane %v1321_v53, 2  ;;  %v1335_v1 = vmul.f32 %v1550_v54, %v1958_v60 }
 0x161   : > { %v1329_v2 = vrot.slane %v1328_v58, 2  ;;  %v1336_v4 = vmul.f32 %v1551_v59, %v1962_v10  ;;  %v885_v0 = vpop.f32.mrb[12].mxu1  ;;  %v1285_v8 = vpop.f32.mrb[12].mxu0 }
 0x162   : > { %v1323_v13 = vadd.f32 %v1322_v62, %v1321_v53  ;;  %v1337_v14 = vadd.f32 %v1335_v1, %v1333_v63  ;;  %v1552_v15 = vadd.f32 %v1285_v8, %v885_v0  ;;  %v887_v16 = vpop.f32.mrb[13].mxu1  ;;  %v1287_v18 = vpop.f32.mrb[13].mxu0 }
 0x163   : > { %v1330_v20 = vadd.f32 %v1329_v2, %v1328_v58  ;;  %v1344_v21 = vadd.f32 %v1336_v4, %v1334_v3  ;;  %v1553_v24 = vadd.f32 %v1287_v18, %v887_v16 }
 0x164   : > { %v1324_v26 = vrot.slane %v1323_v13, 1  ;;  %v1338_v27 = vrot.slane %v1337_v14, 4  ;;  %v1351_v41 = vmul.f32 %v1552_v15, %v1956_v5 }
 0x165   : > { %v1331_v33 = vrot.slane %v1330_v20, 1  ;;  %v1345_v23 = vrot.slane %v1344_v21, 4  ;;  %v893_v34 = vpop.f32.mrb[14].mxu1  ;;  %v1292_v36 = vpop.f32.mrb[14].mxu0  ;;  %v1352_v25 = vmul.f32 %v1553_v24, %v1960_v6 }
 0x166   : > { %v1325_v44 = vadd.f32 %v1324_v26, %v1323_v13  ;;  %v1339_v22 = vadd.f32 %v1338_v27, %v1337_v14  ;;  %v1554_v31 = vadd.f32 %v1292_v36, %v893_v34  ;;  %v895_v38 = vpop.f32.mrb[15].mxu1  ;;  %v1294_v39 = vpop.f32.mrb[15].mxu0 }
 0x167   : > { %v1332_v9 = vadd.f32 %v1331_v33, %v1330_v20  ;;  %v1346_v12 = vadd.f32 %v1345_v23, %v1344_v21  ;;  %v1555_v30 = vadd.f32 %v1294_v39, %v895_v38 }
 0x168   : > { %v1370_v37 = vsel %vm1369_vm1, %v1307_v43, %v1325_v44  ;;  %v1340_v40 = vrot.slane %v1339_v22, 2  ;;  %v1353_v42 = vmul.f32 %v1554_v31, %v1958_v60 }
 0x169   : > { %v1371_v45 = vsel %vm1369_vm1, %v1314_v61, %v1332_v9  ;;  %v1347_v46 = vrot.slane %v1346_v12, 2  ;;  %v1354_v32 = vmul.f32 %v1555_v30, %v1962_v10 }
 0x16a   : > { %v1341_v47 = vadd.f32 %v1340_v40, %v1339_v22  ;;  %v1355_v17 = vadd.f32 %v1353_v42, %v1351_v41 }
 0x16b   : > { %v1348_v35 = vadd.f32 %v1347_v46, %v1346_v12  ;;  %v1362_v28 = vadd.f32 %v1354_v32, %v1352_v25 }
 0x16c   : > { %v1342_v48 = vrot.slane %v1341_v47, 1  ;;  %v1356_v49 = vrot.slane %v1355_v17, 4 }
 0x16d   : > { %v1349_v50 = vrot.slane %v1348_v35, 1  ;;  %v1363_v7 = vrot.slane %v1362_v28, 4 }
 0x16e   : > { %v1343_v5 = vadd.f32 %v1342_v48, %v1341_v47  ;;  %v1357_v51 = vadd.f32 %v1356_v49, %v1355_v17 }
 0x16f   : > { %v1350_v60 = vadd.f32 %v1349_v50, %v1348_v35  ;;  %v1364_v29 = vadd.f32 %v1363_v7, %v1362_v28 }
 0x170   : > { %v1373_v52 = vsel %vm1372_vm2, %v1370_v37, %v1343_v5  ;;  %v1358_v53 = vrot.slane %v1357_v51, 2 }
 0x171   : > { %v1374_v54 = vsel %vm1372_vm2, %v1371_v45, %v1350_v60  ;;  %v1365_v6 = vrot.slane %v1364_v29, 2 }
 0x172   : > { %v1359_v55 = vadd.f32 %v1358_v53, %v1357_v51 }
 0x173   : > { %v1366_v10 = vadd.f32 %v1365_v6, %v1364_v29 }
 0x174   : > { %v1360_v56 = vrot.slane %v1359_v55, 1 }
 0x175   : > { %v1367_v57 = vrot.slane %v1366_v10, 1 }
 0x176   : > { %v1361_v58 = vadd.f32 %v1360_v56, %v1359_v55 }
 0x177   : > { %v1368_v59 = vadd.f32 %v1367_v57, %v1366_v10 }
 0x178   : > { %v1376_v62 = vsel %vm1375_vm3, %v1373_v52, %v1361_v58 }
 0x179   : > { %v1377_v63 = vsel %vm1375_vm3, %v1374_v54, %v1368_v59 }
 0x17a   : > { %v1380_v1 = vcombine.low %v1376_v62, %v1377_v63 }
 0x17c   : > { %1382 = vst [vmem:[%s201_s24] sm:$0xff] %v1380_v1 }
 0x17d PF: > { %s12_s11 = sadd.s32 1, %s1671_s11   ;;  %s1998_s9 = smov %s1667_s10 }
 0x17e   : > { %p9_p5 = scmp.ge.s32.totalorder %s12_s11, 4   ;;  %s1999_s10 = smov %s2001_s12 }
 0x180   :  { %11 = sbr.rel (!%p9_p5) target bundleno = 2 (0x2), region = 61 }

</bundles_post_ra>
